<compile_context>
chip_gen: v5e
topology: v5e:2x2
jax: 0.10.0
libtpu: 0.0.40
codegen_flags: <defaults>
</compile_context>

<pallas_src>
import jax
import jax.numpy as jnp
from jax.experimental import pallas as pl
from jax.experimental.pallas import tpu as pltpu


def _round_up(n, m):
    return ((n + m - 1) // m) * m


def _mlp_kernel(x_ref, w1_ref, b1_ref, w2_ref, b2_ref, w3_ref, b3_ref, o_ref):
    # Cast the f32 input tile to bf16 on-chip (VPU) -> MXU operand.
    x = x_ref[...].astype(jnp.bfloat16)

    # fc1 + ReLU  (bf16 MXU operands, f32 accumulate, f32 VPU epilogue).
    h1 = jnp.dot(x, w1_ref[...], preferred_element_type=jnp.float32)
    h1 = jnp.maximum(h1 + b1_ref[...], 0.0)
    # dropout(p=0.2): identity in eval mode.
    # TODO(synk): training-mode dropout would use pltpu.prng_seed + pltpu.stateful_bernoulli.
    h1 = h1.astype(jnp.bfloat16)

    # fc2 + ReLU (h2 stays f32; it feeds only VPU math below).
    h2 = jnp.dot(h1, w2_ref[...], preferred_element_type=jnp.float32)
    h2 = jnp.maximum(h2 + b2_ref[...], 0.0)

    # out_delay (128 -> 1): VPU multiply + lane reduction; writes the true
    # (tb, 1) column (4 B/row of HBM writeback).
    o_ref[...] = jnp.sum(h2 * w3_ref[...], axis=-1, keepdims=True) + b3_ref[...]


def _choose_batch_tile(batch, tb):
    """Clamp batch tile: multiple of 8, <= batch, >= 2 tiles for large batches."""
    b8 = _round_up(batch, 8)
    tb = min(_round_up(max(tb, 8), 8), b8)
    # Keep at least 2 grid steps when the batch is worth splitting so the
    # "parallel" axis can shard across v7x's two TensorCores.
    if tb >= b8 and b8 >= 256:
        tb = _round_up(pl.cdiv(b8, 2), 8)
    return tb


def delay_predictor_wide_nn(x, params, *, tb=1024):
    """x: (B, input_dim) float32 -> (B, 1) float32."""
    w1, b1, w2, b2, w3, b3 = params
    batch, in_dim = x.shape
    tb = _choose_batch_tile(batch, tb)
    grid = (pl.cdiv(batch, tb),)

    return pl.pallas_call(
        _mlp_kernel,
        out_shape=jax.ShapeDtypeStruct((batch, 1), jnp.float32),
        grid_spec=pl.GridSpec(
            grid=grid,
            in_specs=[
                pl.BlockSpec((tb, in_dim), lambda i: (i, 0)),   # x tile (pipelined)
                pl.BlockSpec(w1.shape, lambda i: (0, 0)),       # weights stay resident
                pl.BlockSpec(b1.shape, lambda i: (0, 0)),
                pl.BlockSpec(w2.shape, lambda i: (0, 0)),
                pl.BlockSpec(b2.shape, lambda i: (0, 0)),
                pl.BlockSpec(w3.shape, lambda i: (0, 0)),
                pl.BlockSpec(b3.shape, lambda i: (0, 0)),
            ],
            out_specs=pl.BlockSpec((tb, 1), lambda i: (i, 0)),
        ),
        # Default scoped-VMEM limits are ample for tb <= 2048 (~<10 MiB live);
        # set vmem_limit_bytes explicitly only if pushing tb >= 4096 on v5e.
        compiler_params=pltpu.CompilerParams(
            dimension_semantics=("parallel",)),
    )(x, w1, b1, w2, b2, w3, b3)


def init_params(key, input_dim):
    """PyTorch-like uniform(+-1/sqrt(fan_in)) init.

    Weights are stored transposed vs. PyTorch ((in, out)); fc1/fc2 weights are
    bf16 (MXU operands).  Biases and the final 128->1 projection (kept as a
    (1, 128) row) stay f32 for the VPU epilogue.
    """
    def linear(k, fan_in, fan_out):
        kw, kb = jax.random.split(k)
        bound = 1.0 / jnp.sqrt(fan_in)
        w = jax.random.uniform(kw, (fan_in, fan_out), jnp.float32, -bound, bound)
        b = jax.random.uniform(kb, (1, fan_out), jnp.float32, -bound, bound)
        return w, b

    k1, k2, k3 = jax.random.split(key, 3)
    w1, b1 = linear(k1, input_dim, 256)
    w2, b2 = linear(k2, 256, 128)
    w3, b3 = linear(k3, 128, 1)

    return (w1.astype(jnp.bfloat16), b1,
            w2.astype(jnp.bfloat16), b2,
            w3.reshape(1, 128),        # (128,1) column -> (1,128) row, f32
            b3.reshape(1, 1))


def reference(x, params):
    """Pure-JAX reference matching the kernel's bf16-operand / f32-accumulate math."""
    w1, b1, w2, b2, w3, b3 = params
    hp = jax.lax.Precision.HIGHEST
    xf = x.astype(jnp.bfloat16).astype(jnp.float32)
    h1 = jnp.maximum(jnp.dot(xf, w1.astype(jnp.float32), precision=hp) + b1, 0.0)
    h1 = h1.astype(jnp.bfloat16).astype(jnp.float32)
    h2 = jnp.maximum(jnp.dot(h1, w2.astype(jnp.float32), precision=hp) + b2, 0.0)
    return jnp.sum(h2 * w3, axis=-1, keepdims=True) + b3


if __name__ == "__main__":
    key = jax.random.PRNGKey(0)
    k_x, k_p = jax.random.split(key)

    # Ragged batch: exercises the >=2-tile split logic and boundary masking.
    batch, input_dim = 300, 32
    x = jax.random.normal(k_x, (batch, input_dim), jnp.float32)
    params = init_params(k_p, input_dim)

    out = jax.block_until_ready(delay_predictor_wide_nn(x, params))
    ref = reference(x, params)

    assert out.shape == (batch, 1), out.shape
    max_err = float(jnp.max(jnp.abs(out - ref)))
    assert jnp.allclose(out, ref, atol=1e-2, rtol=1e-2), max_err
    print("KERNEL_OK")
</pallas_src>

<mosaic_0001>
module attributes {stable_mosaic.version = 11 : i64} {
  func.func @_mlp_kernel(%arg0: i32, %arg1: memref<152x32xf32, #tpu.memory_space<vmem>>, %arg2: memref<32x256xbf16, #tpu.memory_space<vmem>>, %arg3: memref<1x256xf32, #tpu.memory_space<vmem>>, %arg4: memref<256x128xbf16, #tpu.memory_space<vmem>>, %arg5: memref<1x128xf32, #tpu.memory_space<vmem>>, %arg6: memref<1x128xf32, #tpu.memory_space<vmem>>, %arg7: memref<1x1xf32, #tpu.memory_space<vmem>>, %arg8: memref<152x1xf32, #tpu.memory_space<vmem>>) attributes {dimension_semantics = [#tpu.dimension_semantics<parallel>], iteration_bounds = array<i64: 2>, scalar_prefetch = 0 : i64, scratch_operands = 0 : i64, tpu.core_type = #tpu.core_type<tc>, window_params = [{transform_indices = @transform_0, window_bounds = array<i64: 152, 32>}, {pipeline_mode = #tpu.pipeline_mode<synchronous>, transform_indices = @transform_1, window_bounds = array<i64: 32, 256>}, {pipeline_mode = #tpu.pipeline_mode<synchronous>, transform_indices = @transform_2, window_bounds = array<i64: 1, 256>}, {pipeline_mode = #tpu.pipeline_mode<synchronous>, transform_indices = @transform_3, window_bounds = array<i64: 256, 128>}, {pipeline_mode = #tpu.pipeline_mode<synchronous>, transform_indices = @transform_4, window_bounds = array<i64: 1, 128>}, {pipeline_mode = #tpu.pipeline_mode<synchronous>, transform_indices = @transform_5, window_bounds = array<i64: 1, 128>}, {pipeline_mode = #tpu.pipeline_mode<synchronous>, transform_indices = @transform_6, window_bounds = array<i64: 1, 1>}, {transform_indices = @transform_7, window_bounds = array<i64: 152, 1>}]} {
    %c0 = arith.constant 0 : index
    %c0_0 = arith.constant 0 : index
    %0 = vector.load %arg1[%c0, %c0_0] : memref<152x32xf32, #tpu.memory_space<vmem>>, vector<152x32xf32>
    %1 = arith.truncf %0 : vector<152x32xf32> to vector<152x32xbf16>
    %c0_1 = arith.constant 0 : index
    %c0_2 = arith.constant 0 : index
    %2 = vector.load %arg2[%c0_1, %c0_2] : memref<32x256xbf16, #tpu.memory_space<vmem>>, vector<32x256xbf16>
    %cst = arith.constant dense<0.000000e+00> : vector<152x256xf32>
    %3 = tpu.matmul %1, %2, %cst {dimension_numbers = #tpu.dot_dimension_numbers<[1], [0], [0], [1], [0, 0, 1, 1], [], []>} : vector<152x32xbf16>, vector<32x256xbf16>, vector<152x256xf32> -> vector<152x256xf32>
    %c0_3 = arith.constant 0 : index
    %c0_4 = arith.constant 0 : index
    %4 = vector.load %arg3[%c0_3, %c0_4] : memref<1x256xf32, #tpu.memory_space<vmem>>, vector<1x256xf32>
    %5 = vector.broadcast %4 : vector<1x256xf32> to vector<152x256xf32>
    %6 = arith.addf %3, %5 : vector<152x256xf32>
    %cst_5 = arith.constant 0.000000e+00 : f32
    %7 = vector.broadcast %cst_5 : f32 to vector<152x256xf32>
    %8 = arith.maximumf %6, %7 : vector<152x256xf32>
    %9 = arith.truncf %8 : vector<152x256xf32> to vector<152x256xbf16>
    %c0_6 = arith.constant 0 : index
    %c0_7 = arith.constant 0 : index
    %10 = vector.load %arg4[%c0_6, %c0_7] : memref<256x128xbf16, #tpu.memory_space<vmem>>, vector<256x128xbf16>
    %cst_8 = arith.constant dense<0.000000e+00> : vector<152x128xf32>
    %11 = tpu.matmul %9, %10, %cst_8 {dimension_numbers = #tpu.dot_dimension_numbers<[1], [0], [0], [1], [0, 0, 1, 1], [], []>} : vector<152x256xbf16>, vector<256x128xbf16>, vector<152x128xf32> -> vector<152x128xf32>
    %c0_9 = arith.constant 0 : index
    %c0_10 = arith.constant 0 : index
    %12 = vector.load %arg5[%c0_9, %c0_10] : memref<1x128xf32, #tpu.memory_space<vmem>>, vector<1x128xf32>
    %13 = vector.broadcast %12 : vector<1x128xf32> to vector<152x128xf32>
    %14 = arith.addf %11, %13 : vector<152x128xf32>
    %cst_11 = arith.constant 0.000000e+00 : f32
    %15 = vector.broadcast %cst_11 : f32 to vector<152x128xf32>
    %16 = arith.maximumf %14, %15 : vector<152x128xf32>
    %c0_12 = arith.constant 0 : index
    %c0_13 = arith.constant 0 : index
    %17 = vector.load %arg6[%c0_12, %c0_13] : memref<1x128xf32, #tpu.memory_space<vmem>>, vector<1x128xf32>
    %18 = vector.broadcast %17 : vector<1x128xf32> to vector<152x128xf32>
    %19 = arith.mulf %16, %18 : vector<152x128xf32>
    %cst_14 = arith.constant dense<0.000000e+00> : vector<152xf32>
    %20 = vector.multi_reduction <add>, %19, %cst_14 [1] : vector<152x128xf32> to vector<152xf32>
    %21 = vector.shape_cast %20 : vector<152xf32> to vector<152x1xf32>
    %c0_15 = arith.constant 0 : index
    %c0_16 = arith.constant 0 : index
    %22 = vector.load %arg7[%c0_15, %c0_16] : memref<1x1xf32, #tpu.memory_space<vmem>>, vector<1x1xf32>
    %23 = vector.broadcast %22 : vector<1x1xf32> to vector<152x1xf32>
    %24 = arith.addf %21, %23 : vector<152x1xf32>
    %c0_17 = arith.constant 0 : index
    %c0_18 = arith.constant 0 : index
    %25 = vector.load %arg8[%c0_17, %c0_18] : memref<152x1xf32, #tpu.memory_space<vmem>>, vector<152x1xf32>
    tpu.vector_store %arg8[%c0_17, %c0_18], %24 {strides = array<i32>} : memref<152x1xf32, #tpu.memory_space<vmem>>, vector<152x1xf32>,
    return
  }
  func.func @transform_0(%arg0: i32) -> (i32, i32) {
    %c0_i32 = arith.constant 0 : i32
    %c0_i32_0 = arith.constant 0 : i32
    return %arg0, %c0_i32 : i32, i32
  }
  func.func @transform_1(%arg0: i32) -> (i32, i32) {
    %c0_i32 = arith.constant 0 : i32
    %c0_i32_0 = arith.constant 0 : i32
    %c0_i32_1 = arith.constant 0 : i32
    return %c0_i32, %c0_i32_0 : i32, i32
  }
  func.func @transform_2(%arg0: i32) -> (i32, i32) {
    %c0_i32 = arith.constant 0 : i32
    %c0_i32_0 = arith.constant 0 : i32
    %c0_i32_1 = arith.constant 0 : i32
    return %c0_i32, %c0_i32_0 : i32, i32
  }
  func.func @transform_3(%arg0: i32) -> (i32, i32) {
    %c0_i32 = arith.constant 0 : i32
    %c0_i32_0 = arith.constant 0 : i32
    %c0_i32_1 = arith.constant 0 : i32
    return %c0_i32, %c0_i32_0 : i32, i32
  }
  func.func @transform_4(%arg0: i32) -> (i32, i32) {
    %c0_i32 = arith.constant 0 : i32
    %c0_i32_0 = arith.constant 0 : i32
    %c0_i32_1 = arith.constant 0 : i32
    return %c0_i32, %c0_i32_0 : i32, i32
  }
  func.func @transform_5(%arg0: i32) -> (i32, i32) {
    %c0_i32 = arith.constant 0 : i32
    %c0_i32_0 = arith.constant 0 : i32
    %c0_i32_1 = arith.constant 0 : i32
    return %c0_i32, %c0_i32_0 : i32, i32
  }
  func.func @transform_6(%arg0: i32) -> (i32, i32) {
    %c0_i32 = arith.constant 0 : i32
    %c0_i32_0 = arith.constant 0 : i32
    %c0_i32_1 = arith.constant 0 : i32
    return %c0_i32, %c0_i32_0 : i32, i32
  }
  func.func @transform_7(%arg0: i32) -> (i32, i32) {
    %c0_i32 = arith.constant 0 : i32
    %c0_i32_0 = arith.constant 0 : i32
    return %arg0, %c0_i32 : i32, i32
  }
}

</mosaic_0001>

<bundles_post_ra>
// kernel: tpu_custom_call.1
= control target key start
LH: loop header
LB: loop body
LE: loop exit
PB: predicated region body
PF: predicated region fallthrough
CT: control target
= control target key end

     0   :  { %s1167_s26 = smov 0   ;;  %s1458_s0 = inlined_call_operand.vmem [shape: f32[300,32], index: 0, kind: input, shape index: {}]   ;;  %s1459_s1 = inlined_call_operand.vmem [shape: bf16[32,256], index: 1, kind: input, shape index: {}]   ;;  %s1460_s2 = inlined_call_operand.vmem [shape: f32[1,256], index: 2, kind: input, shape index: {}]   ;;  %s1461_s3 = inlined_call_operand.vmem [shape: bf16[256,128], index: 3, kind: input, shape index: {}]   ;;  %s1462_s4 = inlined_call_operand.vmem [shape: f32[1,128], index: 4, kind: input, shape index: {}]   ;;  %s1463_s5 = inlined_call_operand.vmem [shape: f32[1,128], index: 5, kind: input, shape index: {}]   ;;  %s1464_s6 = inlined_call_operand.<no memory space> [shape: f32[1,1], index: 6, kind: input, shape index: {}]   ;;  %s1465_s7 = inlined_call_operand.vmem [shape: f32[300,1], index: 7, kind: output, shape index: {}]  }
   0x1   :  { %v12_v0 = vstv %s1464_s6 }
   0x2   :  { %13 = vst [vmem:[#allocation2] sm:$0x1] %v12_v0 }
   0x3 LB: > { %s976_s27 = sadd.s32 4294967295, %s1122_s26   ;;  %p980_p0 = scmp.ge.s32.totalorder %s1122_s26, 1  ;;  %s1122_s26 = sphi %s1167_s26, %s19_s26  }
   0x4   : > { %p240_p1 = scmp.lt.s32.totalorder %s1122_s26, 3 }
   0x6   : > { %p241_p2 = pnand %p980_p0, %p240_p1 }
   0x7   : > { %s272_s20 = smul.u32 (!%p241_p2), 19, %s976_s27 }
   0x8   : > { %244 = sbr.rel (%p241_p2) target bundleno = 566 (0x236), region = 48 }
   0x9   : > { %p273_p3 = scmp.lt.s32.totalorder (!%p241_p2), %s272_s20, 37 }
   0xd   : > { %v993_v1 = vld [vmem:[%s1459_s1 + $0x10] sm:$0xf]  ;;  %v1088_v2 = vld [vmem:[%s1459_s1 + $0x14] sm:$0xf0]  ;;  %v1087_v3 = vld [vmem:[%s1459_s1 + $0x14] sm:$0xf] }
   0xe   : > { %v994_v4 = vor.u32 %v1088_v2, %v993_v1  ;;  %v995_v5 = vld [vmem:[%s1459_s1 + $0x18] sm:$0xf0]  ;;  %v985_v6 = vld [vmem:[%s1459_s1] sm:$0xf]  ;;  %v1086_v7 = vld [vmem:[%s1459_s1 + $0x4] sm:$0xf0] }
   0xf   : > { %v998_v8 = vor.u32 %v1087_v3, %v995_v5  ;;  %v1085_v9 = vld [vmem:[%s1459_s1 + $0x4] sm:$0xf]  ;;  %v987_v10 = vld [vmem:[%s1459_s1 + $0x8] sm:$0xf0]  ;;  %v986_v11 = vor.u32 %v1086_v7, %v985_v6  ;;  %s1467_s20 = smov (!%p273_p3, %s272_s20), 37  ;;  %vm344_vm0 = vcmask 261120  }
  0x10   : > { %381 = vmatpush.bf16.msra.mxu0 %v994_v4  ;;  %v990_v12 = vor.u32 %v1085_v9, %v987_v10  ;;  %s981_s21 = sshll.u32 %s1467_s20, 3  ;;  %v1096_v28 = vld [vmem:[%s1461_s3 + $0x38] sm:$0xff]  ;;  %v1095_v33 = vld [vmem:[%s1461_s3 + $0x30] sm:$0xff]  ;;  %v1094_v35 = vld [vmem:[%s1461_s3 + $0x28] sm:$0xff]  ;;  %vm900_vm1 = vcmask 7168  }
  0x11   : > { %439 = vmatpush.bf16.msra.mxu1 %v998_v8  ;;  %s1207_s24 = scalar_lea.vmem %s1458_s0, %s981_s21  ;;  %v1104_v29 = vld [vmem:[%s1461_s3 + $0x78] sm:$0xff]  ;;  %681 = vmatpush.bf16.msra.mxu2 %v1096_v28  ;;  %v1103_v34 = vld [vmem:[%s1461_s3 + $0x70] sm:$0xff]  ;;  %v1102_v36 = vld [vmem:[%s1461_s3 + $0x68] sm:$0xff]  ;;  %s1389_s23 = scalar_lea.vmem %s1465_s7, %s981_s21 }
  0x12   : > { %v285_v13 = vld [vmem:[%s1207_s24] sm:$0xff]  ;;  %v286_v14 = vld [vmem:[%s1207_s24 + $0x8] sm:$0xff]  ;;  %v287_v16 = vld [vmem:[%s1207_s24 + $0x10] sm:$0xff]  ;;  %739 = vmatpush.bf16.msra.mxu3 %v1104_v29 }
  0x13   : > { %v304_v15 = vpack.c.bf16 %v286_v14, %v285_v13  ;;  %v288_v17 = vld [vmem:[%s1207_s24 + $0x18] sm:$0xff]  ;;  %v289_v19 = vld [vmem:[%s1207_s24 + $0x20] sm:$0xff]  ;;  %v290_v20 = vld [vmem:[%s1207_s24 + $0x28] sm:$0xff] }
  0x14   : > { %382 = vmatpush.bf16.msra.mxu0 %v986_v11  ;;  %v305_v18 = vpack.c.bf16 %v288_v17, %v287_v16  ;;  %v306_v21 = vpack.c.bf16 %v290_v20, %v289_v19  ;;  %v291_v22 = vld [vmem:[%s1207_s24 + $0x30] sm:$0xff]  ;;  %v292_v23 = vld [vmem:[%s1207_s24 + $0x38] sm:$0xff]  ;;  %v293_v25 = vld [vmem:[%s1207_s24 + $0x40] sm:$0xff] }
  0x15   : > { %440 = vmatpush.bf16.msra.mxu1 %v990_v12  ;;  %v307_v24 = vpack.c.bf16 %v292_v23, %v291_v22  ;;  %v294_v26 = vld [vmem:[%s1207_s24 + $0x48] sm:$0xff]  ;;  %v295_v30 = vld [vmem:[%s1207_s24 + $0x50] sm:$0xff]  ;;  %v296_v31 = vld [vmem:[%s1207_s24 + $0x58] sm:$0xff]  ;;  %682 = vmatpush.bf16.msra.mxu2 %v1095_v33 }
  0x16   : > { %v308_v27 = vpack.c.bf16 %v294_v26, %v293_v25  ;;  %v309_v32 = vpack.c.bf16 %v296_v31, %v295_v30  ;;  %740 = vmatpush.bf16.msra.mxu3 %v1103_v34  ;;  %v1093_v37 = vld [vmem:[%s1461_s3 + $0x20] sm:$0xff]  ;;  %v298_v40 = vld [vmem:[%s1207_s24 + $0x68] sm:$0xff]  ;;  %v1092_v41 = vld [vmem:[%s1461_s3 + $0x18] sm:$0xff] }
  0x17   : > { %999 = vmatmul.msk.bf16.vlgmr.msra.gmra.mxu0 %vm344_vm0, %v304_v15  ;;  %v1101_v38 = vld [vmem:[%s1461_s3 + $0x60] sm:$0xff]  ;;  %v1100_v42 = vld [vmem:[%s1461_s3 + $0x58] sm:$0xff]  ;;  %v1091_v44 = vld [vmem:[%s1461_s3 + $0x10] sm:$0xff] }
  0x18   : > { %1009 = vmatmul.msk.bf16.vlgmr.msra.gmra.mxu1 %vm344_vm0, %v304_v15  ;;  %v297_v39 = vld [vmem:[%s1207_s24 + $0x60] sm:$0xff]  ;;  %v1099_v45 = vld [vmem:[%s1461_s3 + $0x50] sm:$0xff]  ;;  %v1090_v46 = vld [vmem:[%s1461_s3 + $0x8] sm:$0xff] }
  0x19   : > { %683 = vmatpush.bf16.msra.mxu2 %v1094_v35  ;;  %v310_v43 = vpack.c.bf16 %v298_v40, %v297_v39  ;;  %v1098_v47 = vld [vmem:[%s1461_s3 + $0x48] sm:$0xff]  ;;  %v1089_v48 = vld [vmem:[%s1461_s3] sm:$0xff]  ;;  %v299_v50 = vld [vmem:[%s1207_s24 + $0x70] sm:$0xff] }
  0x1a   : > { %741 = vmatpush.bf16.msra.mxu3 %v1102_v36  ;;  %v1097_v49 = vld [vmem:[%s1461_s3 + $0x40] sm:$0xff]  ;;  %v300_v51 = vld [vmem:[%s1207_s24 + $0x78] sm:$0xff]  ;;  %v302_v54 = vld [vmem:[%s1207_s24 + $0x88] sm:$0xff] }
  0x1b   : > { %v311_v52 = vpack.c.bf16 %v300_v51, %v299_v50  ;;  %v301_v53 = vld [vmem:[%s1207_s24 + $0x80] sm:$0xff]  ;;  %v303_v7 = vld [vmem:[%s1207_s24 + $0x90] sm:$0xff] }
  0x1c   : > { %v312_v55 = vpack.c.bf16 %v302_v54, %v301_v53  ;;  %v318_v56 = vld [vmem:[%s1460_s2] sm:$0x3]  ;;  %v313_v10 = vpack.c.bf16 %v303_v7, %v303_v7 }
  0x1d   : > { %684 = vmatpush.bf16.msra.mxu2 %v1093_v37  ;;  %v1294_v59 = vperm.slane %v318_v56, 0  ;;  %v1296_v60 = vperm.slane %v318_v56, 1 }
  0x1e   : > { %742 = vmatpush.bf16.msra.mxu3 %v1101_v38 }
  0x21   : > { %685 = vmatpush.bf16.msra.mxu2 %v1092_v41 }
  0x22   : > { %743 = vmatpush.bf16.msra.mxu3 %v1100_v42 }
  0x25   : > { %686 = vmatpush.bf16.msra.mxu2 %v1091_v44 }
  0x26   : > { %744 = vmatpush.bf16.msra.mxu3 %v1099_v45 }
  0x27   : > { %1000 = vmatmul.msk.bf16.gmra.mxu0 %vm344_vm0, %v305_v18 }
  0x28   : > { %1010 = vmatmul.msk.bf16.gmra.mxu1 %vm344_vm0, %v305_v18 }
  0x29   : > { %687 = vmatpush.bf16.msra.mxu2 %v1090_v46 }
  0x2a   : > { %745 = vmatpush.bf16.msra.mxu3 %v1098_v47 }
  0x2d   : > { %688 = vmatpush.bf16.msra.mxu2 %v1089_v48 }
  0x2e   : > { %746 = vmatpush.bf16.msra.mxu3 %v1097_v49 }
  0x37   : > { %1001 = vmatmul.msk.bf16.gmra.mxu0 %vm344_vm0, %v306_v21 }
  0x38   : > { %1011 = vmatmul.msk.bf16.gmra.mxu1 %vm344_vm0, %v306_v21 }
  0x47   : > { %1002 = vmatmul.msk.bf16.gmra.mxu0 %vm344_vm0, %v307_v24 }
  0x48   : > { %1012 = vmatmul.msk.bf16.gmra.mxu1 %vm344_vm0, %v307_v24 }
  0x57   : > { %1003 = vmatmul.msk.bf16.gmra.mxu0 %vm344_vm0, %v308_v27 }
  0x58   : > { %1013 = vmatmul.msk.bf16.gmra.mxu1 %vm344_vm0, %v308_v27 }
  0x67   : > { %1004 = vmatmul.msk.bf16.gmra.mxu0 %vm344_vm0, %v309_v32 }
  0x68   : > { %1014 = vmatmul.msk.bf16.gmra.mxu1 %vm344_vm0, %v309_v32 }
  0x77   : > { %1005 = vmatmul.msk.bf16.gmra.mxu0 %vm344_vm0, %v310_v43 }
  0x78   : > { %1015 = vmatmul.msk.bf16.gmra.mxu1 %vm344_vm0, %v310_v43 }
  0x87   : > { %1006 = vmatmul.msk.bf16.gmra.mxu0 %vm344_vm0, %v311_v52 }
  0x88   : > { %1016 = vmatmul.msk.bf16.gmra.mxu1 %vm344_vm0, %v311_v52 }
  0x94   : > { %v384_v57 = vpop.f32.mrf.mxu0 }
  0x95   : > { %v442_v58 = vpop.f32.mrf.mxu1  ;;  %v385_v61 = vadd.f32 %v384_v57, %v1294_v59 }
  0x96   : > { %v443_v62 = vadd.f32 %v442_v58, %v1296_v60 }
  0x97   : > { %1007 = vmatmul.msk.bf16.gmra.mxu0 %vm344_vm0, %v312_v55  ;;  %v491_v3 = vmax.f32 %v385_v61, 0.0 }
  0x98   : > { %1017 = vmatmul.msk.bf16.gmra.mxu1 %vm344_vm0, %v312_v55  ;;  %v492_v4 = vmax.f32 %v443_v62, 0.0 }
  0x9c   : > { %v386_v63 = vpop.f32.mrf.mxu0 }
  0x9d   : > { %v444_v0 = vpop.f32.mrf.mxu1  ;;  %v387_v1 = vadd.f32 %v386_v63, %v1294_v59 }
  0x9e   : > { %v445_v2 = vadd.f32 %v444_v0, %v1296_v60 }
  0x9f   : > { %v493_v5 = vmax.f32 %v387_v1, 0.0 }
  0xa0   : > { %v494_v6 = vmax.f32 %v445_v2, 0.0 }
  0xa1   : > { %v529_v8 = vpack.c.bf16 %v493_v5, %v491_v3 }
  0xa2   : > { %v530_v9 = vpack.c.bf16 %v494_v6, %v492_v4 }
  0xa3   : > { %689 = vmatmul.bf16.vlgmr.msra.gmra.mxu2 %v529_v8 }
  0xa4   : > { %747 = vmatmul.bf16.vlgmr.msra.gmra.mxu3 %v530_v9  ;;  %v389_v11 = vpop.f32.mrf.mxu0 }
  0xa5   : > { %v447_v12 = vpop.f32.mrf.mxu1  ;;  %v390_v13 = vadd.f32 %v389_v11, %v1294_v59 }
  0xa6   : > { %v448_v14 = vadd.f32 %v447_v12, %v1296_v60 }
  0xa7   : > { %1008 = vmatmul.msk.bf16.gmra.mxu0 %vm344_vm0, %v313_v10  ;;  %v495_v19 = vmax.f32 %v390_v13, 0.0 }
  0xa8   : > { %1018 = vmatmul.msk.bf16.gmra.mxu1 %vm344_vm0, %v313_v10  ;;  %v496_v20 = vmax.f32 %v448_v14, 0.0 }
  0xac   : > { %v391_v15 = vpop.f32.mrf.mxu0 }
  0xad   : > { %v449_v16 = vpop.f32.mrf.mxu1  ;;  %v392_v17 = vadd.f32 %v391_v15, %v1294_v59 }
  0xae   : > { %v450_v18 = vadd.f32 %v449_v16, %v1296_v60 }
  0xaf   : > { %v497_v21 = vmax.f32 %v392_v17, 0.0 }
  0xb0   : > { %v498_v22 = vmax.f32 %v450_v18, 0.0 }
  0xb1   : > { %v531_v23 = vpack.c.bf16 %v497_v21, %v495_v19 }
  0xb2   : > { %v532_v24 = vpack.c.bf16 %v498_v22, %v496_v20 }
  0xb3   : > { %694 = vmatmul.bf16.gmra.mxu2 %v531_v23 }
  0xb4   : > { %752 = vmatmul.bf16.gmra.mxu3 %v532_v24  ;;  %v394_v25 = vpop.f32.mrf.mxu0 }
  0xb5   : > { %v452_v26 = vpop.f32.mrf.mxu1  ;;  %v395_v27 = vadd.f32 %v394_v25, %v1294_v59 }
  0xb6   : > { %v453_v28 = vadd.f32 %v452_v26, %v1296_v60 }
  0xb7   : > { %v499_v33 = vmax.f32 %v395_v27, 0.0 }
  0xb8   : > { %v500_v34 = vmax.f32 %v453_v28, 0.0 }
  0xbc   : > { %v396_v29 = vpop.f32.mrf.mxu0 }
  0xbd   : > { %v454_v30 = vpop.f32.mrf.mxu1  ;;  %v397_v31 = vadd.f32 %v396_v29, %v1294_v59 }
  0xbe   : > { %v455_v32 = vadd.f32 %v454_v30, %v1296_v60 }
  0xbf   : > { %v501_v35 = vmax.f32 %v397_v31, 0.0 }
  0xc0   : > { %v502_v36 = vmax.f32 %v455_v32, 0.0 }
  0xc1   : > { %v533_v37 = vpack.c.bf16 %v501_v35, %v499_v33 }
  0xc2   : > { %v534_v38 = vpack.c.bf16 %v502_v36, %v500_v34 }
  0xc3   : > { %699 = vmatmul.bf16.gmra.mxu2 %v533_v37 }
  0xc4   : > { %757 = vmatmul.bf16.gmra.mxu3 %v534_v38  ;;  %v399_v39 = vpop.f32.mrf.mxu0 }
  0xc5   : > { %v457_v40 = vpop.f32.mrf.mxu1  ;;  %v400_v41 = vadd.f32 %v399_v39, %v1294_v59 }
  0xc6   : > { %v458_v42 = vadd.f32 %v457_v40, %v1296_v60 }
  0xc7   : > { %v503_v47 = vmax.f32 %v400_v41, 0.0 }
  0xc8   : > { %v504_v48 = vmax.f32 %v458_v42, 0.0 }
  0xcc   : > { %v401_v43 = vpop.f32.mrf.mxu0 }
  0xcd   : > { %v459_v44 = vpop.f32.mrf.mxu1  ;;  %v402_v45 = vadd.f32 %v401_v43, %v1294_v59 }
  0xce   : > { %v460_v46 = vadd.f32 %v459_v44, %v1296_v60 }
  0xcf   : > { %v505_v49 = vmax.f32 %v402_v45, 0.0 }
  0xd0   : > { %v506_v50 = vmax.f32 %v460_v46, 0.0 }
  0xd1   : > { %v535_v51 = vpack.c.bf16 %v505_v49, %v503_v47 }
  0xd2   : > { %v536_v52 = vpack.c.bf16 %v506_v50, %v504_v48 }
  0xd3   : > { %704 = vmatmul.bf16.gmra.mxu2 %v535_v51 }
  0xd4   : > { %762 = vmatmul.bf16.gmra.mxu3 %v536_v52  ;;  %v404_v53 = vpop.f32.mrf.mxu0 }
  0xd5   : > { %v462_v54 = vpop.f32.mrf.mxu1  ;;  %v405_v55 = vadd.f32 %v404_v53, %v1294_v59 }
  0xd6   : > { %v463_v56 = vadd.f32 %v462_v54, %v1296_v60 }
  0xd7   : > { %v507_v63 = vmax.f32 %v405_v55, 0.0 }
  0xd8   : > { %v508_v0 = vmax.f32 %v463_v56, 0.0 }
  0xdc   : > { %v406_v57 = vpop.f32.mrf.mxu0 }
  0xdd   : > { %v464_v58 = vpop.f32.mrf.mxu1  ;;  %v407_v61 = vadd.f32 %v406_v57, %v1294_v59 }
  0xde   : > { %v465_v62 = vadd.f32 %v464_v58, %v1296_v60 }
  0xdf   : > { %v509_v1 = vmax.f32 %v407_v61, 0.0 }
  0xe0   : > { %v510_v2 = vmax.f32 %v465_v62, 0.0 }
  0xe1   : > { %v537_v3 = vpack.c.bf16 %v509_v1, %v507_v63  ;;  %v1342_v63 = vld [vmem:[%s1462_s4] ss:$0 sm:$0xff] }
  0xe2   : > { %v538_v4 = vpack.c.bf16 %v510_v2, %v508_v0 }
  0xe3   : > { %709 = vmatmul.bf16.gmra.mxu2 %v537_v3 }
  0xe4   : > { %767 = vmatmul.bf16.gmra.mxu3 %v538_v4  ;;  %v409_v5 = vpop.f32.mrf.mxu0 }
  0xe5   : > { %v467_v6 = vpop.f32.mrf.mxu1  ;;  %v410_v7 = vadd.f32 %v409_v5, %v1294_v59 }
  0xe6   : > { %v468_v8 = vadd.f32 %v467_v6, %v1296_v60 }
  0xe7   : > { %v511_v13 = vmax.f32 %v410_v7, 0.0 }
  0xe8   : > { %v512_v14 = vmax.f32 %v468_v8, 0.0  ;;  %v1350_v8 = vld [vmem:[%s1463_s5] ss:$0 sm:$0xff] }
  0xec   : > { %v411_v9 = vpop.f32.mrf.mxu0 }
  0xed   : > { %v469_v10 = vpop.f32.mrf.mxu1  ;;  %v412_v11 = vadd.f32 %v411_v9, %v1294_v59 }
  0xee   : > { %v470_v12 = vadd.f32 %v469_v10, %v1296_v60 }
  0xef   : > { %v513_v15 = vmax.f32 %v412_v11, 0.0 }
  0xf0   : > { %v514_v16 = vmax.f32 %v470_v12, 0.0 }
  0xf1   : > { %v539_v17 = vpack.c.bf16 %v513_v15, %v511_v13 }
  0xf2   : > { %v540_v18 = vpack.c.bf16 %v514_v16, %v512_v14 }
  0xf3   : > { %714 = vmatmul.bf16.gmra.mxu2 %v539_v17 }
  0xf4   : > { %772 = vmatmul.bf16.gmra.mxu3 %v540_v18  ;;  %v414_v19 = vpop.f32.mrf.mxu0 }
  0xf5   : > { %v472_v20 = vpop.f32.mrf.mxu1  ;;  %v415_v21 = vadd.f32 %v414_v19, %v1294_v59 }
  0xf6   : > { %v473_v22 = vadd.f32 %v472_v20, %v1296_v60 }
  0xf7   : > { %v515_v27 = vmax.f32 %v415_v21, 0.0 }
  0xf8   : > { %v516_v28 = vmax.f32 %v473_v22, 0.0 }
  0xfc   : > { %v416_v23 = vpop.f32.mrf.mxu0 }
  0xfd   : > { %v474_v24 = vpop.f32.mrf.mxu1  ;;  %v417_v25 = vadd.f32 %v416_v23, %v1294_v59 }
  0xfe   : > { %v475_v26 = vadd.f32 %v474_v24, %v1296_v60 }
  0xff   : > { %v517_v29 = vmax.f32 %v417_v25, 0.0 }
 0x100   : > { %v518_v30 = vmax.f32 %v475_v26, 0.0 }
 0x101   : > { %v541_v31 = vpack.c.bf16 %v517_v29, %v515_v27 }
 0x102   : > { %v542_v32 = vpack.c.bf16 %v518_v30, %v516_v28 }
 0x103   : > { %719 = vmatmul.bf16.gmra.mxu2 %v541_v31 }
 0x104   : > { %777 = vmatmul.bf16.gmra.mxu3 %v542_v32  ;;  %v419_v33 = vpop.f32.mrf.mxu0 }
 0x105   : > { %v477_v34 = vpop.f32.mrf.mxu1  ;;  %v420_v35 = vadd.f32 %v419_v33, %v1294_v59 }
 0x106   : > { %v478_v36 = vadd.f32 %v477_v34, %v1296_v60 }
 0x107   : > { %v519_v41 = vmax.f32 %v420_v35, 0.0 }
 0x108   : > { %v520_v42 = vmax.f32 %v478_v36, 0.0 }
 0x10c   : > { %v421_v37 = vpop.f32.mrf.mxu0 }
 0x10d   : > { %v479_v38 = vpop.f32.mrf.mxu1  ;;  %v422_v39 = vadd.f32 %v421_v37, %v1294_v59 }
 0x10e   : > { %v480_v40 = vadd.f32 %v479_v38, %v1296_v60 }
 0x10f   : > { %v521_v43 = vmax.f32 %v422_v39, 0.0 }
 0x110   : > { %v522_v44 = vmax.f32 %v480_v40, 0.0 }
 0x111   : > { %v543_v45 = vpack.c.bf16 %v521_v43, %v519_v41 }
 0x112   : > { %v544_v46 = vpack.c.bf16 %v522_v44, %v520_v42 }
 0x113   : > { %724 = vmatmul.bf16.gmra.mxu2 %v543_v45 }
 0x114   : > { %782 = vmatmul.bf16.gmra.mxu3 %v544_v46  ;;  %v424_v47 = vpop.f32.mrf.mxu0 }
 0x115   : > { %v482_v48 = vpop.f32.mrf.mxu1  ;;  %v425_v49 = vadd.f32 %v424_v47, %v1294_v59 }
 0x116   : > { %v483_v50 = vadd.f32 %v482_v48, %v1296_v60 }
 0x117   : > { %v523_v55 = vmax.f32 %v425_v49, 0.0 }
 0x118   : > { %v524_v56 = vmax.f32 %v483_v50, 0.0 }
 0x11c   : > { %v426_v51 = vpop.f32.mrf.mxu0 }
 0x11d   : > { %v484_v52 = vpop.f32.mrf.mxu1  ;;  %v427_v53 = vadd.f32 %v426_v51, %v1294_v59 }
 0x11e   : > { %v485_v54 = vadd.f32 %v484_v52, %v1296_v60 }
 0x11f   : > { %v525_v57 = vmax.f32 %v427_v53, 0.0 }
 0x120   : > { %v526_v58 = vmax.f32 %v485_v54, 0.0 }
 0x121   : > { %v545_v61 = vpack.c.bf16 %v525_v57, %v523_v55 }
 0x122   : > { %v546_v62 = vpack.c.bf16 %v526_v58, %v524_v56 }
 0x123   : > { %729 = vmatmul.bf16.gmra.mxu2 %v545_v61 }
 0x124   : > { %787 = vmatmul.bf16.gmra.mxu3 %v546_v62  ;;  %v429_v0 = vpop.f32.mrf.mxu0 }
 0x125   : > { %v487_v1 = vpop.f32.mrf.mxu1  ;;  %v430_v4 = vadd.f32 %v429_v0, %v1294_v59 }
 0x126   : > { %v690_v2 = vpop.f32.mrf.mxu2  ;;  %v488_v5 = vadd.f32 %v487_v1, %v1296_v60 }
 0x127   : > { %v748_v3 = vpop.f32.mrf.mxu3  ;;  %v691_v6 = vadd.f32 %v1342_v63, %v690_v2  ;;  %v527_v9 = vmax.f32 %v430_v4, 0.0 }
 0x128   : > { %v528_v10 = vmax.f32 %v488_v5, 0.0 }
 0x129   : > { %v749_v7 = vadd.f32 %v748_v3, %v691_v6  ;;  %v547_v60 = vpack.c.bf16 %v527_v9, %v527_v9 }
 0x12a   : > { %v548_v17 = vpack.c.bf16 %v528_v10, %v528_v10 }
 0x12b   : > { %v797_v11 = vmax.f32 %v749_v7, 0.0 }
 0x12c   : > { %v431_v12 = vpop.f32.mrf.mxu0 }
 0x12d   : > { %v489_v13 = vpop.f32.mrf.mxu1  ;;  %v820_v14 = vmul.f32 %v1350_v8, %v797_v11 }
 0x12e   : > { %v692_v15 = vpop.f32.mrf.mxu2 }
 0x12f   : > { %v750_v16 = vpop.f32.mrf.mxu3  ;;  %v693_v59 = vadd.f32 %v1342_v63, %v692_v15  ;;  %839 = vadd.xlane.f32.xlu0 %v820_v14 }
 0x131   : > { %v751_v18 = vadd.f32 %v750_v16, %v693_v59 }
 0x133   : > { %v798_v19 = vmax.f32 %v751_v18, 0.0  ;;  %734 = vmatmul.bf16.gmra.mxu2 %v547_v60 }
 0x134   : > { %792 = vmatmul.bf16.gmra.mxu3 %v548_v17 }
 0x135   : > { %v821_v20 = vmul.f32 %v1350_v8, %v798_v19 }
 0x136   : > { %v695_v21 = vpop.f32.mrf.mxu2 }
 0x137   : > { %v753_v22 = vpop.f32.mrf.mxu3  ;;  %v696_v23 = vadd.f32 %v1342_v63, %v695_v21  ;;  %841 = vadd.xlane.f32.xlu0 %v821_v20 }
 0x139   : > { %v754_v24 = vadd.f32 %v753_v22, %v696_v23 }
 0x13b   : > { %v799_v25 = vmax.f32 %v754_v24, 0.0 }
 0x13d   : > { %v822_v26 = vmul.f32 %v1350_v8, %v799_v25 }
 0x13e   : > { %v697_v27 = vpop.f32.mrf.mxu2 }
 0x13f   : > { %v755_v28 = vpop.f32.mrf.mxu3  ;;  %v698_v29 = vadd.f32 %v1342_v63, %v697_v27  ;;  %843 = vadd.xlane.f32.xlu1 %v822_v26 }
 0x141   : > { %v756_v30 = vadd.f32 %v755_v28, %v698_v29 }
 0x143   : > { %v800_v31 = vmax.f32 %v756_v30, 0.0 }
 0x145   : > { %v823_v32 = vmul.f32 %v1350_v8, %v800_v31 }
 0x146   : > { %v700_v33 = vpop.f32.mrf.mxu2 }
 0x147   : > { %v758_v34 = vpop.f32.mrf.mxu3  ;;  %v701_v35 = vadd.f32 %v1342_v63, %v700_v33  ;;  %845 = vadd.xlane.f32.xlu1 %v823_v32 }
 0x149   : > { %v759_v36 = vadd.f32 %v758_v34, %v701_v35 }
 0x14b   : > { %v801_v37 = vmax.f32 %v759_v36, 0.0 }
 0x14d   : > { %v824_v38 = vmul.f32 %v1350_v8, %v801_v37 }
 0x14e   : > { %v702_v39 = vpop.f32.mrf.mxu2 }
 0x14f   : > { %v760_v40 = vpop.f32.mrf.mxu3  ;;  %v703_v41 = vadd.f32 %v1342_v63, %v702_v39  ;;  %847 = vadd.xlane.f32.xlu2 %v824_v38 }
 0x151   : > { %v761_v42 = vadd.f32 %v760_v40, %v703_v41  ;;  %v1382_v40 = vld [vmem:[#allocation2] ss:$0 sm:$0xff] }
 0x153   : > { %v802_v43 = vmax.f32 %v761_v42, 0.0 }
 0x155   : > { %v825_v44 = vmul.f32 %v1350_v8, %v802_v43 }
 0x156   : > { %v705_v45 = vpop.f32.mrf.mxu2 }
 0x157   : > { %v763_v46 = vpop.f32.mrf.mxu3  ;;  %v706_v47 = vadd.f32 %v1342_v63, %v705_v45  ;;  %849 = vadd.xlane.f32.xlu2 %v825_v44 }
 0x159   : > { %v764_v48 = vadd.f32 %v763_v46, %v706_v47 }
 0x15b   : > { %v803_v49 = vmax.f32 %v764_v48, 0.0 }
 0x15d   : > { %v826_v50 = vmul.f32 %v1350_v8, %v803_v49 }
 0x15e   : > { %v707_v51 = vpop.f32.mrf.mxu2 }
 0x15f   : > { %v765_v52 = vpop.f32.mrf.mxu3  ;;  %v708_v53 = vadd.f32 %v1342_v63, %v707_v51  ;;  %851 = vadd.xlane.f32.xlu0 %v826_v50 }
 0x161   : > { %v766_v54 = vadd.f32 %v765_v52, %v708_v53 }
 0x163   : > { %v804_v55 = vmax.f32 %v766_v54, 0.0 }
 0x165   : > { %v827_v56 = vmul.f32 %v1350_v8, %v804_v55 }
 0x166   : > { %v710_v57 = vpop.f32.mrf.mxu2 }
 0x167   : > { %v768_v58 = vpop.f32.mrf.mxu3  ;;  %v711_v61 = vadd.f32 %v1342_v63, %v710_v57  ;;  %853 = vadd.xlane.f32.xlu1 %v827_v56 }
 0x169   : > { %v769_v62 = vadd.f32 %v768_v58, %v711_v61 }
 0x16b   : > { %v805_v0 = vmax.f32 %v769_v62, 0.0 }
 0x16d   : > { %v828_v1 = vmul.f32 %v1350_v8, %v805_v0 }
 0x16e   : > { %v712_v2 = vpop.f32.mrf.mxu2 }
 0x16f   : > { %v770_v3 = vpop.f32.mrf.mxu3  ;;  %v713_v4 = vadd.f32 %v1342_v63, %v712_v2  ;;  %855 = vadd.xlane.f32.xlu2 %v828_v1 }
 0x171   : > { %v771_v5 = vadd.f32 %v770_v3, %v713_v4 }
 0x173   : > { %v806_v6 = vmax.f32 %v771_v5, 0.0 }
 0x175   : > { %v829_v7 = vmul.f32 %v1350_v8, %v806_v6 }
 0x176   : > { %v715_v9 = vpop.f32.mrf.mxu2 }
 0x177   : > { %v773_v10 = vpop.f32.mrf.mxu3  ;;  %v716_v11 = vadd.f32 %v1342_v63, %v715_v9  ;;  %857 = vadd.xlane.f32.xlu0 %v829_v7 }
 0x179   : > { %v774_v12 = vadd.f32 %v773_v10, %v716_v11 }
 0x17b   : > { %v807_v13 = vmax.f32 %v774_v12, 0.0 }
 0x17d   : > { %v830_v14 = vmul.f32 %v1350_v8, %v807_v13 }
 0x17e   : > { %v717_v15 = vpop.f32.mrf.mxu2 }
 0x17f   : > { %v775_v16 = vpop.f32.mrf.mxu3  ;;  %v718_v59 = vadd.f32 %v1342_v63, %v717_v15  ;;  %859 = vadd.xlane.f32.xlu1 %v830_v14 }
 0x181   : > { %v776_v60 = vadd.f32 %v775_v16, %v718_v59 }
 0x183   : > { %v808_v17 = vmax.f32 %v776_v60, 0.0 }
 0x185   : > { %v831_v18 = vmul.f32 %v1350_v8, %v808_v17 }
 0x186   : > { %v720_v19 = vpop.f32.mrf.mxu2 }
 0x187   : > { %v778_v20 = vpop.f32.mrf.mxu3  ;;  %v721_v21 = vadd.f32 %v1342_v63, %v720_v19  ;;  %861 = vadd.xlane.f32.xlu2 %v831_v18 }
 0x189   : > { %v779_v22 = vadd.f32 %v778_v20, %v721_v21 }
 0x18b   : > { %v809_v23 = vmax.f32 %v779_v22, 0.0 }
 0x18d   : > { %v832_v24 = vmul.f32 %v1350_v8, %v809_v23 }
 0x18e   : > { %v722_v25 = vpop.f32.mrf.mxu2 }
 0x18f   : > { %v780_v26 = vpop.f32.mrf.mxu3  ;;  %v723_v27 = vadd.f32 %v1342_v63, %v722_v25  ;;  %863 = vadd.xlane.f32.xlu0 %v832_v24 }
 0x191   : > { %v781_v28 = vadd.f32 %v780_v26, %v723_v27 }
 0x193   : > { %v810_v29 = vmax.f32 %v781_v28, 0.0 }
 0x195   : > { %v833_v30 = vmul.f32 %v1350_v8, %v810_v29 }
 0x196   : > { %v725_v31 = vpop.f32.mrf.mxu2 }
 0x197   : > { %v783_v32 = vpop.f32.mrf.mxu3  ;;  %v726_v33 = vadd.f32 %v1342_v63, %v725_v31  ;;  %865 = vadd.xlane.f32.xlu1 %v833_v30 }
 0x199   : > { %v784_v34 = vadd.f32 %v783_v32, %v726_v33 }
 0x19b   : > { %v811_v35 = vmax.f32 %v784_v34, 0.0 }
 0x19d   : > { %v834_v36 = vmul.f32 %v1350_v8, %v811_v35 }
 0x19e   : > { %v727_v37 = vpop.f32.mrf.mxu2 }
 0x19f   : > { %v785_v38 = vpop.f32.mrf.mxu3  ;;  %v728_v39 = vadd.f32 %v1342_v63, %v727_v37  ;;  %867 = vadd.xlane.f32.xlu2 %v834_v36 }
 0x1a1   : > { %v786_v41 = vadd.f32 %v785_v38, %v728_v39 }
 0x1a2   : > { %v840_v42 = vpop.xlane.xlu0 %839 }
 0x1a3   : > { %v812_v43 = vmax.f32 %v786_v41, 0.0  ;;  %v881_v44 = vadd.f32 %v1382_v40, %v840_v42 }
 0x1a5   : > { %901 = vst.msk [vmem:[%s1389_s23] sm:$0xff] %vm900_vm1, %v881_v44  ;;  %v835_v45 = vmul.f32 %v1350_v8, %v812_v43 }
 0x1a6   : > { %v730_v46 = vpop.f32.mrf.mxu2 }
 0x1a7   : > { %v788_v47 = vpop.f32.mrf.mxu3  ;;  %v731_v48 = vadd.f32 %v1342_v63, %v730_v46  ;;  %869 = vadd.xlane.f32.xlu0 %v835_v45 }
 0x1a9   : > { %v789_v49 = vadd.f32 %v788_v47, %v731_v48 }
 0x1aa   : > { %v842_v50 = vpop.xlane.xlu0 %841 }
 0x1ab   : > { %v813_v51 = vmax.f32 %v789_v49, 0.0  ;;  %v882_v52 = vadd.f32 %v1382_v40, %v842_v50 }
 0x1ad   : > { %902 = vst.msk [vmem:[%s1389_s23 + $0x8] sm:$0xff] %vm900_vm1, %v882_v52  ;;  %v836_v53 = vmul.f32 %v1350_v8, %v813_v51 }
 0x1ae   : > { %v732_v54 = vpop.f32.mrf.mxu2 }
 0x1af   : > { %v790_v55 = vpop.f32.mrf.mxu3  ;;  %v733_v56 = vadd.f32 %v1342_v63, %v732_v54  ;;  %871 = vadd.xlane.f32.xlu1 %v836_v53 }
 0x1b1   : > { %v791_v57 = vadd.f32 %v790_v55, %v733_v56 }
 0x1b2   : > { %v844_v58 = vpop.xlane.xlu1 %843 }
 0x1b3   : > { %v814_v61 = vmax.f32 %v791_v57, 0.0  ;;  %v883_v62 = vadd.f32 %v1382_v40, %v844_v58 }
 0x1b5   : > { %903 = vst.msk [vmem:[%s1389_s23 + $0x10] sm:$0xff] %vm900_vm1, %v883_v62  ;;  %v837_v0 = vmul.f32 %v1350_v8, %v814_v61 }
 0x1b6   : > { %v735_v1 = vpop.f32.mrf.mxu2 }
 0x1b7   : > { %v793_v2 = vpop.f32.mrf.mxu3  ;;  %v736_v3 = vadd.f32 %v1342_v63, %v735_v1  ;;  %873 = vadd.xlane.f32.xlu2 %v837_v0 }
 0x1b9   : > { %v794_v4 = vadd.f32 %v793_v2, %v736_v3 }
 0x1ba   : > { %v846_v5 = vpop.xlane.xlu1 %845 }
 0x1bb   : > { %v815_v6 = vmax.f32 %v794_v4, 0.0  ;;  %v884_v7 = vadd.f32 %v1382_v40, %v846_v5 }
 0x1bd   : > { %904 = vst.msk [vmem:[%s1389_s23 + $0x18] sm:$0xff] %vm900_vm1, %v884_v7  ;;  %v838_v9 = vmul.f32 %v1350_v8, %v815_v6 }
 0x1be   : > { %v737_v10 = vpop.f32.mrf.mxu2 }
 0x1bf   : > { %v795_v11 = vpop.f32.mrf.mxu3  ;;  %875 = vadd.xlane.f32.xlu0 %v838_v9 }
 0x1c2   : > { %v848_v12 = vpop.xlane.xlu2 %847 }
 0x1c3   : > { %v885_v63 = vadd.f32 %v1382_v40, %v848_v12 }
 0x1c5   : > { %905 = vst.msk [vmem:[%s1389_s23 + $0x20] sm:$0xff] %vm900_vm1, %v885_v63 }
 0x1ca   : > { %v850_v13 = vpop.xlane.xlu2 %849 }
 0x1cb   : > { %v886_v14 = vadd.f32 %v1382_v40, %v850_v13 }
 0x1cd   : > { %906 = vst.msk [vmem:[%s1389_s23 + $0x28] sm:$0xff] %vm900_vm1, %v886_v14 }
 0x1d2   : > { %v852_v15 = vpop.xlane.xlu0 %851 }
 0x1d3   : > { %v887_v16 = vadd.f32 %v1382_v40, %v852_v15 }
 0x1d5   : > { %907 = vst.msk [vmem:[%s1389_s23 + $0x30] sm:$0xff] %vm900_vm1, %v887_v16 }
 0x1da   : > { %v854_v8 = vpop.xlane.xlu1 %853 }
 0x1db   : > { %v888_v59 = vadd.f32 %v1382_v40, %v854_v8 }
 0x1dd   : > { %908 = vst.msk [vmem:[%s1389_s23 + $0x38] sm:$0xff] %vm900_vm1, %v888_v59 }
 0x1e2   : > { %v856_v60 = vpop.xlane.xlu2 %855 }
 0x1e3   : > { %v889_v17 = vadd.f32 %v1382_v40, %v856_v60 }
 0x1e5   : > { %909 = vst.msk [vmem:[%s1389_s23 + $0x40] sm:$0xff] %vm900_vm1, %v889_v17 }
 0x1ea   : > { %v858_v18 = vpop.xlane.xlu0 %857 }
 0x1eb   : > { %v890_v19 = vadd.f32 %v1382_v40, %v858_v18 }
 0x1ed   : > { %910 = vst.msk [vmem:[%s1389_s23 + $0x48] sm:$0xff] %vm900_vm1, %v890_v19 }
 0x1f2   : > { %v860_v20 = vpop.xlane.xlu1 %859 }
 0x1f3   : > { %v891_v21 = vadd.f32 %v1382_v40, %v860_v20 }
 0x1f5   : > { %911 = vst.msk [vmem:[%s1389_s23 + $0x50] sm:$0xff] %vm900_vm1, %v891_v21 }
 0x1fa   : > { %v862_v22 = vpop.xlane.xlu2 %861 }
 0x1fb   : > { %v892_v23 = vadd.f32 %v1382_v40, %v862_v22 }
 0x1fd   : > { %912 = vst.msk [vmem:[%s1389_s23 + $0x58] sm:$0xff] %vm900_vm1, %v892_v23 }
 0x202   : > { %v864_v24 = vpop.xlane.xlu0 %863 }
 0x203   : > { %v893_v25 = vadd.f32 %v1382_v40, %v864_v24 }
 0x205   : > { %913 = vst.msk [vmem:[%s1389_s23 + $0x60] sm:$0xff] %vm900_vm1, %v893_v25 }
 0x20a   : > { %v866_v26 = vpop.xlane.xlu1 %865 }
 0x20b   : > { %v894_v27 = vadd.f32 %v1382_v40, %v866_v26 }
 0x20d   : > { %914 = vst.msk [vmem:[%s1389_s23 + $0x68] sm:$0xff] %vm900_vm1, %v894_v27 }
 0x212   : > { %v868_v28 = vpop.xlane.xlu2 %867 }
 0x213   : > { %v895_v29 = vadd.f32 %v1382_v40, %v868_v28 }
 0x215   : > { %915 = vst.msk [vmem:[%s1389_s23 + $0x70] sm:$0xff] %vm900_vm1, %v895_v29 }
 0x21a   : > { %v870_v30 = vpop.xlane.xlu0 %869 }
 0x21b   : > { %v896_v31 = vadd.f32 %v1382_v40, %v870_v30 }
 0x21d   : > { %916 = vst.msk [vmem:[%s1389_s23 + $0x78] sm:$0xff] %vm900_vm1, %v896_v31 }
 0x222   : > { %v872_v32 = vpop.xlane.xlu1 %871 }
 0x223   : > { %v897_v33 = vadd.f32 %v1382_v40, %v872_v32 }
 0x225   : > { %917 = vst.msk [vmem:[%s1389_s23 + $0x80] sm:$0xff] %vm900_vm1, %v897_v33 }
 0x22a   : > { %v874_v34 = vpop.xlane.xlu2 %873 }
 0x22b   : > { %v898_v35 = vadd.f32 %v1382_v40, %v874_v34 }
 0x22d   : > { %918 = vst.msk [vmem:[%s1389_s23 + $0x88] sm:$0xff] %vm900_vm1, %v898_v35 }
 0x232   : > { %v876_v36 = vpop.xlane.xlu0 %875 }
 0x233   : > { %v899_v37 = vadd.f32 %v1382_v40, %v876_v36 }
 0x235   : > { %919 = vst.msk [vmem:[%s1389_s23 + $0x90] sm:$0xff] %vm900_vm1, %v899_v37 }
 0x236 PF: > { %s19_s26 = sadd.s32 1, %s1122_s26  }
 0x237   : > { %p16_p4 = scmp.ge.s32.totalorder %s19_s26, 4  }
 0x239   :  { %18 = sbr.rel (!%p16_p4) target bundleno = 3 (0x3), region = 78 }

</bundles_post_ra>
